<compile_context>
chip_gen: v7x
topology: tpu7x:2x2x1
jax: 0.10.0
libtpu: 0.0.40
codegen_flags: <defaults>
</compile_context>

<pallas_src>
import functools

import jax
import jax.numpy as jnp
from jax import lax
from jax.experimental import pallas as pl
from jax.experimental.pallas import tpu as pltpu


def _round_up(n: int, m: int) -> int:
    return ((n + m - 1) // m) * m


def weighted_linear_kernel(x_ref, v_ref, s_ref, b_ref, o_ref):
    # Transpose-free contraction: (tm, x_in) . (x_out_p, x_in) -> (tm, x_out_p)
    y = lax.dot_general(
        x_ref[...], v_ref[...],
        dimension_numbers=(((1,), (1,)), ((), ())),
        preferred_element_type=jnp.float32,
    )
    # Hoisted weight-norm applied as a per-output-column scale, then bias + ReLU
    # (all f32 elementwise — safe on v5e as well).
    y = y * s_ref[...] + b_ref[...]
    o_ref[...] = jnp.maximum(y, 0.0).astype(o_ref.dtype)


def weighted_linear(x, weight_v, weight_g, bias, *, tm=256, mxu_dtype=None):
    """Forward pass of WeightedLinear in eval mode.

    x:        (B, x_in)
    weight_v: (x_out, x_in)   -- weight_norm 'v' (direction)
    weight_g: (x_out, 1)      -- weight_norm 'g' (magnitude)
    bias:     (x_out,)
    mxu_dtype: optionally jnp.bfloat16 to halve weight DMA bytes and use the
               bf16 MXU path on v6e/v7x (f32 accumulation kept).
    """
    B, x_in = x.shape
    x_out = weight_v.shape[0]

    # --- Hoisted weight-norm: per-row scale computed once, outside the grid ---
    v_f32 = weight_v.astype(jnp.float32)
    row_norm = jnp.sqrt(jnp.sum(v_f32 * v_f32, axis=1, keepdims=True))  # (x_out,1)
    scale = (weight_g.reshape(x_out, 1).astype(jnp.float32) / row_norm)  # (x_out,1)
    scale = scale.reshape(1, x_out)
    bias2d = bias.reshape(1, x_out).astype(jnp.float32)

    # --- Lane-dense output: pad x_out to a multiple of 128 ---
    x_out_p = _round_up(x_out, 128)

    # --- Batch tiling: multiple of 8 sublanes, big tiles, >=2 grid steps if possible ---
    b8 = _round_up(B, 8)
    tm_eff = max(8, min(_round_up(tm, 8), b8))
    if b8 // tm_eff < 2 and b8 >= 16:
        # Keep at least two parallel grid steps (v7x has 2 TensorCores/chip).
        tm_eff = _round_up(pl.cdiv(b8, 2), 8)
    B_p = _round_up(B, tm_eff)

    # --- Operand dtype for the MXU (f32 by default; bf16 opt-in for v6e/v7x) ---
    op_dtype = x.dtype if mxu_dtype is None else mxu_dtype

    xp = jnp.pad(x.astype(op_dtype), ((0, B_p - B), (0, 0)))
    vp = jnp.pad(weight_v.astype(op_dtype), ((0, x_out_p - x_out), (0, 0)))
    sp = jnp.pad(scale, ((0, 0), (0, x_out_p - x_out)))
    bp = jnp.pad(bias2d, ((0, 0), (0, x_out_p - x_out)))

    grid = (B_p // tm_eff,)

    op_bytes = jnp.dtype(op_dtype).itemsize
    cost = pl.CostEstimate(
        flops=2 * B_p * x_in * x_out_p,
        transcendentals=0,
        bytes_accessed=(B_p * x_in + x_out_p * x_in) * op_bytes
        + 2 * x_out_p * 4
        + B_p * x_out_p * 4,
    )

    out = pl.pallas_call(
        weighted_linear_kernel,
        out_shape=jax.ShapeDtypeStruct((B_p, x_out_p), jnp.float32),
        grid_spec=pltpu.PrefetchScalarGridSpec(
            num_scalar_prefetch=0,
            grid=grid,
            in_specs=[
                pl.BlockSpec((tm_eff, x_in), lambda i: (i, 0)),     # x tile
                pl.BlockSpec((x_out_p, x_in), lambda i: (0, 0)),    # v (grid-invariant)
                pl.BlockSpec((1, x_out_p), lambda i: (0, 0)),       # scale (grid-invariant)
                pl.BlockSpec((1, x_out_p), lambda i: (0, 0)),       # bias (grid-invariant)
            ],
            out_specs=pl.BlockSpec((tm_eff, x_out_p), lambda i: (i, 0)),
        ),
        compiler_params=pltpu.CompilerParams(
            dimension_semantics=("parallel",)),
        cost_estimate=cost,
    )(xp, vp, sp, bp)

    # Strip batch / lane padding.
    return out[:B, :x_out]


def reference(x, weight_v, weight_g, bias):
    row_norm = jnp.sqrt(jnp.sum(weight_v * weight_v, axis=1, keepdims=True))
    w_eff = weight_v * (weight_g / row_norm)
    y = x @ w_eff.T + bias
    return jnp.maximum(y, 0.0)


if __name__ == "__main__":
    # Small shapes consistent with the module: batch=16, x_in=32, x_out=64.
    B, X_IN, X_OUT = 16, 32, 64

    key = jax.random.PRNGKey(0)
    kx, kv, kb = jax.random.split(key, 3)

    x = jax.random.normal(kx, (B, X_IN), dtype=jnp.float32)

    # Deterministic parameter init mimicking nn.Linear defaults:
    bound = 1.0 / (X_IN ** 0.5)
    weight_v = jax.random.uniform(kv, (X_OUT, X_IN), jnp.float32, -bound, bound)
    bias = jax.random.uniform(kb, (X_OUT,), jnp.float32, -bound, bound)
    # weight_norm init: g = ||v|| per output row (so w_eff == v initially).
    weight_g = jnp.sqrt(jnp.sum(weight_v * weight_v, axis=1, keepdims=True))

    run = jax.jit(functools.partial(weighted_linear))
    out = run(x, weight_v, weight_g, bias)
    out = jax.block_until_ready(out)

    ref = reference(x, weight_v, weight_g, bias)
    assert out.shape == (B, X_OUT)
    assert jnp.allclose(out, ref, atol=1e-5, rtol=1e-5), "mismatch vs reference"

    print("KERNEL_OK")
</pallas_src>

<mosaic_0001>
module attributes {stable_mosaic.version = 11 : i64} {
  func.func @weighted_linear_kernel(%arg0: i32, %arg1: memref<8x32xf32, #tpu.memory_space<vmem>>, %arg2: memref<128x32xf32, #tpu.memory_space<vmem>>, %arg3: memref<1x128xf32, #tpu.memory_space<vmem>>, %arg4: memref<1x128xf32, #tpu.memory_space<vmem>>, %arg5: memref<8x128xf32, #tpu.memory_space<vmem>>) attributes {dimension_semantics = [#tpu.dimension_semantics<parallel>], iteration_bounds = array<i64: 2>, scalar_prefetch = 0 : i64, scratch_operands = 0 : i64, tpu.core_type = #tpu.core_type<tc>, window_params = [{transform_indices = @transform_0, window_bounds = array<i64: 8, 32>}, {pipeline_mode = #tpu.pipeline_mode<synchronous>, transform_indices = @transform_1, window_bounds = array<i64: 128, 32>}, {pipeline_mode = #tpu.pipeline_mode<synchronous>, transform_indices = @transform_2, window_bounds = array<i64: 1, 128>}, {pipeline_mode = #tpu.pipeline_mode<synchronous>, transform_indices = @transform_3, window_bounds = array<i64: 1, 128>}, {transform_indices = @transform_4, window_bounds = array<i64: 8, 128>}]} {
    %c0 = arith.constant 0 : index
    %c0_0 = arith.constant 0 : index
    %0 = vector.load %arg1[%c0, %c0_0] : memref<8x32xf32, #tpu.memory_space<vmem>>, vector<8x32xf32>
    %c0_1 = arith.constant 0 : index
    %c0_2 = arith.constant 0 : index
    %1 = vector.load %arg2[%c0_1, %c0_2] : memref<128x32xf32, #tpu.memory_space<vmem>>, vector<128x32xf32>
    %cst = arith.constant dense<0.000000e+00> : vector<8x128xf32>
    %2 = tpu.matmul %0, %1, %cst {dimension_numbers = #tpu.dot_dimension_numbers<[1], [1], [0], [0], [0, 0, 1, 0], [], []>} : vector<8x32xf32>, vector<128x32xf32>, vector<8x128xf32> -> vector<8x128xf32>
    %c0_3 = arith.constant 0 : index
    %c0_4 = arith.constant 0 : index
    %3 = vector.load %arg3[%c0_3, %c0_4] : memref<1x128xf32, #tpu.memory_space<vmem>>, vector<1x128xf32>
    %4 = vector.broadcast %3 : vector<1x128xf32> to vector<8x128xf32>
    %5 = arith.mulf %2, %4 : vector<8x128xf32>
    %c0_5 = arith.constant 0 : index
    %c0_6 = arith.constant 0 : index
    %6 = vector.load %arg4[%c0_5, %c0_6] : memref<1x128xf32, #tpu.memory_space<vmem>>, vector<1x128xf32>
    %7 = vector.broadcast %6 : vector<1x128xf32> to vector<8x128xf32>
    %8 = arith.addf %5, %7 : vector<8x128xf32>
    %cst_7 = arith.constant 0.000000e+00 : f32
    %9 = vector.broadcast %cst_7 : f32 to vector<8x128xf32>
    %10 = arith.maximumf %8, %9 : vector<8x128xf32>
    %c0_8 = arith.constant 0 : index
    %c0_9 = arith.constant 0 : index
    %11 = vector.load %arg5[%c0_8, %c0_9] : memref<8x128xf32, #tpu.memory_space<vmem>>, vector<8x128xf32>
    tpu.vector_store %arg5[%c0_8, %c0_9], %10 {strides = array<i32>} : memref<8x128xf32, #tpu.memory_space<vmem>>, vector<8x128xf32>,
    return
  }
  func.func @transform_0(%arg0: i32) -> (i32, i32) {
    %c0_i32 = arith.constant 0 : i32
    %c0_i32_0 = arith.constant 0 : i32
    return %arg0, %c0_i32 : i32, i32
  }
  func.func @transform_1(%arg0: i32) -> (i32, i32) {
    %c0_i32 = arith.constant 0 : i32
    %c0_i32_0 = arith.constant 0 : i32
    %c0_i32_1 = arith.constant 0 : i32
    return %c0_i32, %c0_i32_0 : i32, i32
  }
  func.func @transform_2(%arg0: i32) -> (i32, i32) {
    %c0_i32 = arith.constant 0 : i32
    %c0_i32_0 = arith.constant 0 : i32
    %c0_i32_1 = arith.constant 0 : i32
    return %c0_i32, %c0_i32_0 : i32, i32
  }
  func.func @transform_3(%arg0: i32) -> (i32, i32) {
    %c0_i32 = arith.constant 0 : i32
    %c0_i32_0 = arith.constant 0 : i32
    %c0_i32_1 = arith.constant 0 : i32
    return %c0_i32, %c0_i32_0 : i32, i32
  }
  func.func @transform_4(%arg0: i32) -> (i32, i32) {
    %c0_i32 = arith.constant 0 : i32
    %c0_i32_0 = arith.constant 0 : i32
    return %arg0, %c0_i32 : i32, i32
  }
}

</mosaic_0001>

<bundles_post_ra>
// kernel: weighted_linear.1
= control target key start
LH: loop header
LB: loop body
LE: loop exit
PB: predicated region body
PF: predicated region fallthrough
CT: control target
= control target key end

     0   :  { %9 = vsyncpa [#allocation3], 0  ;;  %s848_s0 = inlined_call_operand.vmem [shape: f32[16,32], index: 0, kind: input, shape index: {}]   ;;  %s849_s1 = inlined_call_operand.vmem [shape: f32[128,32], index: 1, kind: input, shape index: {}]   ;;  %s850_s2 = inlined_call_operand.vmem [shape: f32[1,128], index: 2, kind: input, shape index: {}]   ;;  %s851_s3 = inlined_call_operand.vmem [shape: f32[1,128], index: 3, kind: input, shape index: {}]   ;;  %s852_s4 = inlined_call_operand.hbm [shape: f32[16,128], index: 4, kind: output, shape index: {}]  }
   0x1   :  { %11 = vsyncpa [#allocation3 + $0x1], 0  ;;  %s671_s15 = smov 0   ;;  %s673_s16 = smov 0  }
   0x2   :  { %s675_s17 = smov 0   ;;  %s677_s18 = smov 0  }
   0x3 LB: > { %s692_s19 = sadd.s32 4294967295, %s640_s18   ;;  %s423_s20 = sadd.s32 4294967294, %s640_s18   ;;  %s640_s18 = sphi %s677_s18, %s860_s18   ;;  %s636_s17 = sphi %s675_s17, %s859_s17   ;;  %s632_s16 = sphi %s673_s16, %s858_s16   ;;  %s628_s15 = sphi %s671_s15, %s857_s15  }
   0x4   : > { %s696_s21 = sadd.s32 1, %s640_s18   ;;  %s113_s22 = sadd.s32 1, %s636_s17 }
   0x5   : > { %s110_s23 = ssub.s32 %s640_s18, %s696_s21  ;;  %p123_p0 = scmp.ne.s32.totalorder %s636_s17, %s632_s16 }
   0x6   : > { %p111_p1 = scmp.eq.s32.totalorder %s110_s23, 0  ;;  %p124_p2 = scmp.eq.s32.totalorder %s692_s19, 1 }
   0x7   : > { %p129_p3 = scmp.ne.s32.totalorder %s632_s16, %s628_s15  ;;  %p130_p4 = scmp.eq.s32.totalorder %s423_s20, 1 }
   0x8   : > { %s707_s24 = scalar_select %p111_p1, %s636_s17, %s113_s22  }
   0x9   : > { %p709_p5 = por %p124_p2, %p123_p0  ;;  %p713_p6 = por %p130_p4, %p129_p3 }
   0xa   : > { %p426_p7 = scmp.ge.s32.totalorder %s640_s18, 1  ;;  %p164_p8 = scmp.lt.s32.totalorder %s640_s18, 3 }
   0xc   : > { %p165_p9 = pnand %p426_p7, %p164_p8 }
   0xd   : > { %v194_v0 = vld [vmem:[%s849_s1] sm:$0xff] (!%p165_p9)  ;;  %v195_v1 = vld [vmem:[%s849_s1 + $0x8] sm:$0xff] (!%p165_p9)  ;;  %vm210_vm0 = vcmask (!%p165_p9), 261120   ;;  %v642_v2 = vmov (!%p165_p9), 0.0|0.0   ;;  %vm643_vm2 = vmmov (!%p165_p9), 0   ;;  %v644_v5 = vmov (!%p165_p9), 0.0  }
   0xe   : > { %168 = sbr.rel (%p165_p9) target bundleno = 311 (0x137), region = 36  ;;  %504 = vmatprep.subr.bf16.mxu0 (!%p165_p9), %v642_v2  ;;  %v505_v3 = vpack.c.bf16 (!%p165_p9), %v195_v1, %v194_v0  ;;  %vm727_vm1 = vmpackc.low (!%p165_p9), %vm210_vm0, %vm210_vm0  ;;  %501 = vmatprep.mubr.msk.f32.mxu0 (!%p165_p9), %vm643_vm2, %v644_v5  ;;  %v196_v6 = vld [vmem:[%s849_s1 + $0x10] sm:$0xff] (!%p165_p9)  ;;  %v197_v7 = vld [vmem:[%s849_s1 + $0x18] sm:$0xff] (!%p165_p9)  ;;  %p189_p10 = scmp.lt.s32.totalorder (!%p165_p9), %s692_s19, 1 }
   0xf   : > { %v509_v8 = vpack.c.bf16 (!%p165_p9), %v197_v7, %v196_v6  ;;  %v198_v9 = vld [vmem:[%s849_s1 + $0x20] sm:$0xff] (!%p165_p9)  ;;  %v199_v10 = vld [vmem:[%s849_s1 + $0x28] sm:$0xff] (!%p165_p9)  ;;  %v200_v12 = vld [vmem:[%s849_s1 + $0x30] sm:$0xff] (!%p165_p9)  ;;  %s186_s30 = sand.u32 (!%p165_p9), 1, %s632_s16   ;;  %s449_s10 = sshll.u32 (!%p165_p9), %s692_s19, 7 }
  0x10   : > { %507 = vmatpush3.bf16.xpose.msk.msra.mxu0 (!%p165_p9), %vm727_vm1, %v505_v3  ;;  %v513_v11 = vpack.c.bf16 (!%p165_p9), %v199_v10, %v198_v9  ;;  %v201_v13 = vld [vmem:[%s849_s1 + $0x38] sm:$0xff] (!%p165_p9)  ;;  %v202_v15 = vld [vmem:[%s849_s1 + $0x40] sm:$0xff] (!%p165_p9)  ;;  %v203_v16 = vld [vmem:[%s849_s1 + $0x48] sm:$0xff] (!%p165_p9)  ;;  %s427_s5 = sshll.u32 (!%p165_p9), %s186_s30, 3  ;;  %s806_s20 = scalar_lea.hbm (!%p165_p9), %s852_s4, %s449_s10 }
  0x11   : > { %508 = vmatprep.subr.bf16.mxu0 (!%p165_p9), %v642_v2  ;;  %v517_v14 = vpack.c.bf16 (!%p165_p9), %v201_v13, %v200_v12  ;;  %v521_v17 = vpack.c.bf16 (!%p165_p9), %v203_v16, %v202_v15  ;;  %v204_v18 = vld [vmem:[%s849_s1 + $0x50] sm:$0xff] (!%p165_p9)  ;;  %v205_v19 = vld [vmem:[%s849_s1 + $0x58] sm:$0xff] (!%p165_p9)  ;;  %v206_v21 = vld [vmem:[%s849_s1 + $0x60] sm:$0xff] (!%p165_p9)  ;;  %s188_s11 = scalar_lea.vmem (!%p165_p9), [#allocation2], %s427_s5 }
  0x12   : > { %v525_v20 = vpack.c.bf16 (!%p165_p9), %v205_v19, %v204_v18  ;;  %v207_v22 = vld [vmem:[%s849_s1 + $0x68] sm:$0xff] (!%p165_p9)  ;;  %v208_v24 = vld [vmem:[%s849_s1 + $0x70] sm:$0xff] (!%p165_p9)  ;;  %v209_v25 = vld [vmem:[%s849_s1 + $0x78] sm:$0xff] (!%p165_p9)  ;;  %s364_s12 = sshll.u32 (!%p165_p9), %s188_s11, 4  ;;  %s808_s12 = int_to_ptr.vmem [resolvable:$true] %s364_s12 }
  0x13   : > { %v529_v23 = vpack.c.bf16 (!%p165_p9), %v207_v22, %v206_v21  ;;  %v533_v26 = vpack.c.bf16 (!%p165_p9), %v209_v25, %v208_v24  ;;  %v446_v28 = vld [vmem:[%s850_s2] ss:$0 sm:$0xff] (!%p165_p9) }
  0x14   : > { %v447_v30 = vld [vmem:[%s851_s3] ss:$0 sm:$0xff] (!%p165_p9) }
  0x15   : > { %s190_s22 = scalar_select %p189_p10, %s692_s19, 1 }
  0x16   : > { %s645_s19 = smov [#allocation2]  }
  0x17   : > { %s428_s23 = sshll.u32 %s190_s22, 3  ;;  %s351_s22 = scalar_lea.sflag [#allocation3], %s186_s30 }
  0x18   : > { %511 = vmatpush3.bf16.xpose.msk.msra.mxu0 %vm727_vm1, %v509_v8  ;;  %s192_s29 = scalar_lea.vmem %s848_s0, %s428_s23  ;;  %s578_s23 = scalar_lea.vmem %s808_s12, 128 }
  0x19   : > { %512 = vmatprep.subr.bf16.mxu0 %v642_v2  ;;  %v193_v27 = vld [vmem:[%s192_s29] sm:$0xff]  ;;  %p579_p11 = scmp.ne.s32.totalorder %s808_s12, %s578_s23  ;;  %s582_s27 = sshll.u32 %s645_s19, 4  ;;  %s583_s27 = int_to_ptr.vmem [resolvable:$false] %s582_s27 }
  0x1a   : > { %s584_s28 = scalar_lea.vmem %s583_s27, 256  ;;  %p585_p0 = scmp.lt.s32.totalorder %s808_s12, %s583_s27 }
  0x1b   : > { %p580_p12 = pnand %p579_p11, %p709_p5  ;;  %p586_p1 = scmp.lt.s32.totalorder %s584_s28, %s578_s23 }
  0x1d   : > { %p581_p13 = pneg %p580_p12  ;;  %p587_p2 = por %p586_p1, %p585_p0 }
  0x1f   : > { %p588_p3 = pnand %p587_p2, %p581_p13 }
  0x20   : > { %515 = vmatpush3.bf16.xpose.msk.msra.mxu0 %vm727_vm1, %v513_v11 }
  0x21   : > { %516 = vmatprep.subr.bf16.mxu0 %v642_v2 }
  0x28   : > { %519 = vmatpush3.bf16.xpose.msk.msra.mxu0 %vm727_vm1, %v517_v14 }
  0x29   : > { %520 = vmatprep.subr.bf16.mxu0 %v642_v2 }
  0x30   : > { %523 = vmatpush3.bf16.xpose.msk.msra.mxu0 %vm727_vm1, %v521_v17 }
  0x31   : > { %524 = vmatprep.subr.bf16.mxu0 %v642_v2 }
  0x38   : > { %527 = vmatpush3.bf16.xpose.msk.msra.mxu0 %vm727_vm1, %v525_v20 }
  0x39   : > { %528 = vmatprep.subr.bf16.mxu0 %v642_v2 }
  0x40   : > { %531 = vmatpush3.bf16.xpose.msk.msra.mxu0 %vm727_vm1, %v529_v23 }
  0x41   : > { %532 = vmatprep.subr.bf16.mxu0 %v642_v2 }
  0x48   : > { %535 = vmatpush3.bf16.xpose.msk.msra.mxu0 %vm727_vm1, %v533_v26 }
  0x4f   : > { %502 = vmatmul.mubr.msk.f32.vlgmr.msra.gmra.mrb[0].mxu0 %vm210_vm0, %v193_v27 }
 0x122   : > { %v328_v29 = vpop.f32.mrb[0].mxu0 }
 0x123   : > { %v339_v31 = vmul.f32 %v446_v28, %v328_v29  ;;  %v503_v32 = vpop.f32.mrb[1].mxu0 }
 0x125   : > { %v347_v33 = vadd.f32 %v447_v30, %v339_v31 }
 0x127   : > { %v348_v34 = vmax.f32 %v347_v33, 0.0 }
 0x129   : > { %349 = vst [vmem:[%s188_s11] sm:$0xff] %v348_v34 }
 0x12a   : > { %591 = shalt.err (!%p588_p3)
}
 0x12b   : > { %s592_s29 = scalar_lea.hbm %s806_s20, 128  ;;  %s596_s6 = scalar_lea.hbm %s852_s4, 256 }
 0x12c   : > { %p593_p4 = scmp.ne.s32.totalorder %s806_s20, %s592_s29  ;;  %p597_p9 = scmp.lt.u32.totalorder %s806_s20, %s852_s4 }
 0x12d   : > { %p598_p10 = scmp.lt.u32.totalorder %s596_s6, %s592_s29  ;;  %p600_p12 = scmp.lt.u32.totalorder %s592_s29, %s806_s20 }
 0x12e   : > { %p594_p7 = pnand %p593_p4, %p709_p5 }
 0x12f   : > { %p599_p11 = por %p598_p10, %p597_p9 }
 0x130   : > { %p595_p8 = pneg %p594_p7 }
 0x131   : > { %p601_p13 = por %p600_p12, %p599_p11 }
 0x133   : > { %p602_p0 = pnand %p601_p13, %p595_p8 }
 0x135   : > { %605 = shalt.err (!%p602_p0)
}
 0x136   : > { %536 = dma.vmem_to_hbm [thread:$0]  (%p709_p5), %s808_s12, 128, %s806_s20, %s351_s22  }
 0x137 PF: > { %p542_p1 = scmp.ge.s32.totalorder %s640_s18, 2  ;;  %s376_s9 = sand.u32 1, %s628_s15  }
 0x138   : > { %s377_s10 = scalar_lea.sflag [#allocation3], %s376_s9 }
 0x139   : > { %p539_p2 = pnand %p542_p1, %p713_p6 }
 0x13b   : > { %623 = dma.done.wait (!%p539_p2), %s377_s10, 128  }
 0x13c   : > { %625 = vsyncadd (!%p539_p2), %s377_s10, 4294967168  ;;  %p14_p3 = scmp.ge.s32.totalorder %s696_s21, 4   ;;  %s857_s15 = smov %s632_s16 }
 0x13d   : > { %s858_s16 = smov %s636_s17  ;;  %s859_s17 = smov %s707_s24 }
 0x13e   : > { %s860_s18 = smov %s696_s21  ;;  %16 = sbr.rel (!%p14_p3) target bundleno = 3 (0x3), region = 71 }
 0x145   :  { %382 = vsyncpa [#allocation3], 1 }
 0x146   :  { %384 = vsyncpa [#allocation3 + $0x1], 1 }

</bundles_post_ra>
